<compile_context>
chip_gen: v5e
topology: v5e:2x2
jax: 0.10.0
libtpu: 0.0.40
codegen_flags: <defaults>
</compile_context>

<pallas_src>
import math
from functools import partial

import jax
import jax.numpy as jnp
from jax.experimental import pallas as pl
from jax.experimental.pallas import tpu as pltpu

TM_MAX = 2048   # batch tile rows: 2 bufs x 2048x784x4B ~= 12.6 MiB of x in VMEM
O_PAD = 128     # lane-dense padded output width


def linear_kernel(x_ref, w_ref, b_ref, o_ref):
    # MXU-native matmul: (tm, 784) @ (784, 128) -> (tm, 128), f32 accumulate.
    acc = jnp.dot(x_ref[...], w_ref[...], preferred_element_type=jnp.float32)
    o_ref[...] = (acc + b_ref[...]).astype(o_ref.dtype)


def prepare_linear_params(w, b):
    """One-time parameter prep (call at setup, NOT per forward).

    Pads the output dim 10 -> 128 (zero columns) and transposes the weight to
    the MXU-native (K, N) = (784, 128) orientation so the kernel's RHS has the
    contraction dim on sublanes and the output dim on lanes.
    """
    O, D = w.shape
    wT_pad = jnp.zeros((D, O_PAD), w.dtype).at[:, :O].set(w.T)   # (784, 128)
    b_pad = jnp.zeros((1, O_PAD), b.dtype).at[0, :O].set(b)      # (1, 128)
    return wT_pad, b_pad


def _pick_tile(B: int) -> int:
    """Batch tile size: multiple of 8, <= TM_MAX, >= 2 tiles for non-trivial B
    (v7x 2-TC sharding), preferring tiles that divide B exactly (no padding)."""
    if B <= 16:
        return B                                  # single tiny tile, full-array block
    cap = min(TM_MAX, (B + 1) // 2)               # guarantee >= 2 tiles
    cap = max(8, (cap // 8) * 8)                  # multiple of 8
    if B % 8 == 0:
        t = cap
        floor_t = max(8, cap // 2)                # only accept reasonably large divisors
        while t >= floor_t:
            if B % t == 0:
                return t                          # divides B: zero tail padding
            t -= 8
    # Fallback: even split; only a small tail block gets zero-padded.
    n = max(2, -(-B // TM_MAX))
    return min(TM_MAX, ((-(-B // n) + 7) // 8) * 8)


@partial(jax.jit, static_argnames=("out_features",))
def mnist_logistic2_forward(x, wT_pad, b_pad, out_features=10):
    """x: (B, 784) f32, wT_pad: (784, 128) f32, b_pad: (1, 128) f32 -> (B, out_features)."""
    B, D = x.shape

    tm = _pick_tile(B)
    n_tiles = -(-B // tm)
    Bp = n_tiles * tm
    # Pad only the tail rows (if any) instead of re-materializing all of x.
    x_p = x if Bp == B else jnp.concatenate(
        [x, jnp.zeros((Bp - B, D), x.dtype)], axis=0)

    cost = pl.CostEstimate(
        flops=2 * B * D * out_features,
        transcendentals=0,
        bytes_accessed=(Bp * D + Bp * O_PAD + D * O_PAD + O_PAD) * 4,
    )

    out = pl.pallas_call(
        linear_kernel,
        out_shape=jax.ShapeDtypeStruct((Bp, O_PAD), jnp.float32),
        grid_spec=pltpu.PrefetchScalarGridSpec(
            num_scalar_prefetch=0,
            grid=(n_tiles,),
            in_specs=[
                pl.BlockSpec((tm, D), lambda i: (i, 0)),       # x tile (pipelined)
                pl.BlockSpec((D, O_PAD), lambda i: (0, 0)),    # weights (resident, K-major)
                pl.BlockSpec((1, O_PAD), lambda i: (0, 0)),    # bias (resident)
            ],
            out_specs=pl.BlockSpec((tm, O_PAD), lambda i: (i, 0)),
        ),
        compiler_params=pltpu.CompilerParams(
            dimension_semantics=("parallel",),   # row tiles independent; shards across v7x TCs
            vmem_limit_bytes=32 << 20,           # headroom for tm=2048 on v5e/v6e/v7x
        ),
        cost_estimate=cost,
    )(x_p, wT_pad, b_pad)

    # Keep the module's (B, 10) semantics; a downstream consumer fused into a
    # larger jit could instead read the padded (Bp, 128) buffer directly.
    return out[:B, :out_features]


if __name__ == "__main__":
    bs, in_features, out_features = 64, 784, 10

    key = jax.random.PRNGKey(0)
    kx, kw, kb = jax.random.split(key, 3)

    # nn.Linear-style U(-1/sqrt(fan_in), 1/sqrt(fan_in)) init.
    bound = 1.0 / math.sqrt(in_features)
    w = jax.random.uniform(kw, (out_features, in_features), jnp.float32, -bound, bound)
    b = jax.random.uniform(kb, (out_features,), jnp.float32, -bound, bound)

    x = jax.random.normal(kx, (bs, in_features), jnp.float32)

    # One-time parameter prep (pad + transpose), outside the per-call path.
    wT_pad, b_pad = prepare_linear_params(w, b)
    jax.block_until_ready((wT_pad, b_pad))

    out = mnist_logistic2_forward(x, wT_pad, b_pad, out_features=out_features)
    jax.block_until_ready(out)

    # Reference check against plain JAX.
    ref = x @ w.T + b
    assert out.shape == (bs, out_features)
    assert jnp.allclose(out, ref, atol=1e-4, rtol=1e-4)

    print("KERNEL_OK")
</pallas_src>

<mosaic_0001>
module attributes {stable_mosaic.version = 11 : i64} {
  func.func @linear_kernel(%arg0: i32, %arg1: memref<32x784xf32, #tpu.memory_space<vmem>>, %arg2: memref<784x128xf32, #tpu.memory_space<vmem>>, %arg3: memref<1x128xf32, #tpu.memory_space<vmem>>, %arg4: memref<32x128xf32, #tpu.memory_space<vmem>>) attributes {dimension_semantics = [#tpu.dimension_semantics<parallel>], iteration_bounds = array<i64: 2>, scalar_prefetch = 0 : i64, scratch_operands = 0 : i64, tpu.core_type = #tpu.core_type<tc>, window_params = [{transform_indices = @transform_0, window_bounds = array<i64: 32, 784>}, {pipeline_mode = #tpu.pipeline_mode<synchronous>, transform_indices = @transform_1, window_bounds = array<i64: 784, 128>}, {pipeline_mode = #tpu.pipeline_mode<synchronous>, transform_indices = @transform_2, window_bounds = array<i64: 1, 128>}, {transform_indices = @transform_3, window_bounds = array<i64: 32, 128>}]} {
    %c0 = arith.constant 0 : index
    %c0_0 = arith.constant 0 : index
    %0 = vector.load %arg1[%c0, %c0_0] : memref<32x784xf32, #tpu.memory_space<vmem>>, vector<32x784xf32>
    %c0_1 = arith.constant 0 : index
    %c0_2 = arith.constant 0 : index
    %1 = vector.load %arg2[%c0_1, %c0_2] : memref<784x128xf32, #tpu.memory_space<vmem>>, vector<784x128xf32>
    %cst = arith.constant dense<0.000000e+00> : vector<32x128xf32>
    %2 = tpu.matmul %0, %1, %cst {dimension_numbers = #tpu.dot_dimension_numbers<[1], [0], [0], [1], [0, 0, 1, 1], [], []>} : vector<32x784xf32>, vector<784x128xf32>, vector<32x128xf32> -> vector<32x128xf32>
    %c0_3 = arith.constant 0 : index
    %c0_4 = arith.constant 0 : index
    %3 = vector.load %arg3[%c0_3, %c0_4] : memref<1x128xf32, #tpu.memory_space<vmem>>, vector<1x128xf32>
    %4 = vector.broadcast %3 : vector<1x128xf32> to vector<32x128xf32>
    %5 = arith.addf %2, %4 : vector<32x128xf32>
    %c0_5 = arith.constant 0 : index
    %c0_6 = arith.constant 0 : index
    %6 = vector.load %arg4[%c0_5, %c0_6] : memref<32x128xf32, #tpu.memory_space<vmem>>, vector<32x128xf32>
    tpu.vector_store %arg4[%c0_5, %c0_6], %5 {strides = array<i32>} : memref<32x128xf32, #tpu.memory_space<vmem>>, vector<32x128xf32>,
    return
  }
  func.func @transform_0(%arg0: i32) -> (i32, i32) {
    %c0_i32 = arith.constant 0 : i32
    %c0_i32_0 = arith.constant 0 : i32
    return %arg0, %c0_i32 : i32, i32
  }
  func.func @transform_1(%arg0: i32) -> (i32, i32) {
    %c0_i32 = arith.constant 0 : i32
    %c0_i32_0 = arith.constant 0 : i32
    %c0_i32_1 = arith.constant 0 : i32
    return %c0_i32, %c0_i32_0 : i32, i32
  }
  func.func @transform_2(%arg0: i32) -> (i32, i32) {
    %c0_i32 = arith.constant 0 : i32
    %c0_i32_0 = arith.constant 0 : i32
    %c0_i32_1 = arith.constant 0 : i32
    return %c0_i32, %c0_i32_0 : i32, i32
  }
  func.func @transform_3(%arg0: i32) -> (i32, i32) {
    %c0_i32 = arith.constant 0 : i32
    %c0_i32_0 = arith.constant 0 : i32
    return %arg0, %c0_i32 : i32, i32
  }
}

</mosaic_0001>

<bundles_post_ra>
// kernel: mnist_logistic2_forward.1
= control target key start
LH: loop header
LB: loop body
LE: loop exit
PB: predicated region body
PF: predicated region fallthrough
CT: control target
= control target key end

     0   :  { %8 = vsyncpa [#allocation3], 0  ;;  %s1006_s0 = inlined_call_operand.hbm [shape: f32[64,784], index: 0, kind: input, shape index: {}]   ;;  %s1007_s1 = inlined_call_operand.hbm [shape: f32[784,128], index: 1, kind: input, shape index: {}]   ;;  %s1008_s2 = inlined_call_operand.vmem [shape: f32[1,128], index: 2, kind: input, shape index: {}]   ;;  %s1009_s3 = inlined_call_operand.vmem [shape: f32[64,128], index: 3, kind: output, shape index: {}]  }
   0x1   :  { %10 = vsyncpa [#allocation3 + $0x1], 0 }
   0x2   :  { %11 = vsyncpa [#allocation5], 0  ;;  %s857_s12 = smov 0   ;;  %s859_s13 = smov 0  }
   0x3   :  { %s861_s14 = smov 0   ;;  %s863_s15 = smov 0  }
   0x4 LB: > { %s640_s16 = sadd.s32 4294967295, %s830_s15   ;;  %p37_p0 = scmp.ne.s32.totalorder %s822_s13, %s818_s12  ;;  %s830_s15 = sphi %s863_s15, %s1017_s15   ;;  %s826_s14 = sphi %s861_s14, %s1016_s14   ;;  %s822_s13 = sphi %s859_s13, %s1015_s13   ;;  %s818_s12 = sphi %s857_s12, %s1014_s12  }
   0x5   : > { %p879_p1 = scmp.eq.s32.totalorder %s640_s16, 0  ;;  %p642_p2 = scmp.ge.s32.totalorder %s830_s15, 1 }
   0x6   : > { %p116_p3 = scmp.lt.s32.totalorder %s830_s15, 3  ;;  %s127_s21 = sshll.u32 %s1007_s1, 4  ;;  %s128_s21 = int_to_ptr.hbm [resolvable:$true] %s127_s21 }
   0x7   : > { %p887_p4 = por %p879_p1, %p37_p0  ;;  %s832_s23 = smov [#allocation4]  }
   0x8   : > { %p894_p5 = pnand %p642_p2, %p116_p3  ;;  %s129_s24 = sshll.u32 %s832_s23, 4  ;;  %s130_s24 = int_to_ptr.vmem [resolvable:$true] %s129_s24 }
   0x9   : > { %s903_s25 = sadd.s32 1, %s830_s15   ;;  %s833_s26 = smov 128  }
   0xa   : > { %p683_p6 = pneg %p894_p5  ;;  %s834_s27 = smov 8  }
   0xb   : > { %s21_s28 = ssub.s32 %s830_s15, %s903_s25  ;;  %s24_s29 = sadd.s32 1, %s826_s14 }
   0xc   : > { %p684_p7 = pnand %p683_p6, %p879_p1  ;;  %p22_p8 = scmp.eq.s32.totalorder %s21_s28, 0 }
   0xd   : > { %p31_p9 = scmp.ne.s32.totalorder %s826_s14, %s822_s13  ;;  %p32_p10 = scmp.eq.s32.totalorder %s830_s15, 0 }
   0xe   : > { %686 = dma.hbm_to_vmem [thread:$0]  (!%p684_p7), %s128_s21, 12544, %s130_s24, [#allocation5], %s833_s26, %s833_s26, %s834_s27  }
   0xf   : > { %p692_p11 = scmp.lt.s32.totalorder %s830_s15, 2  ;;  %p33_p12 = por %p32_p10, %p31_p9 }
  0x10   : > { %s913_s30 = scalar_select %p22_p8, %s826_s14, %s24_s29  }
  0x11   : > { %s146_s4 = sand.u32 1, %s826_s14   ;;  %s675_s6 = smul.u32 224, %s830_s15 }
  0x12   : > { %s674_s5 = smul.u32 224, %s146_s4  ;;  %p917_p13 = pnand %p692_p11, %p33_p12 }
  0x13   : > { %s156_s10 = scalar_lea.hbm %s1006_s0, %s675_s6  ;;  %s147_s20 = scalar_lea.sflag [#allocation3], %s146_s4 }
  0x14   : > { %s150_s11 = scalar_lea.vmem [#allocation2], %s674_s5  ;;  %s157_s19 = sshll.u32 %s156_s10, 4  ;;  %s158_s19 = int_to_ptr.hbm [resolvable:$true] %s157_s19 }
  0x15   : > { %s159_s12 = sshll.u32 %s150_s11, 4  ;;  %s762_s21 = sshra.s32 %s158_s19, 4  ;;  %s160_s12 = int_to_ptr.vmem [resolvable:$true] %s159_s12  ;;  %s763_s21 = int_to_ptr.hbm [resolvable:$true] %s762_s21 }
  0x16   : > { %s764_s23 = scalar_lea.hbm %s763_s21, 224  ;;  %p766_p2 = pneg %p917_p13 }
  0x17   : > { %p765_p0 = scmp.ne.s32.totalorder %s763_s21, %s764_s23  ;;  %s769_s27 = scalar_lea.hbm %s1006_s0, 448 }
  0x18   : > { %p770_p7 = scmp.lt.s32.totalorder %s763_s21, %s1006_s0  ;;  %p771_p8 = scmp.lt.s32.totalorder %s769_s27, %s764_s23 }
  0x19   : > { %p767_p3 = pnand %p766_p2, %p765_p0 }
  0x1a   : > { %p772_p9 = por %p771_p8, %p770_p7 }
  0x1b   : > { %p768_p6 = pneg %p767_p3 }
  0x1d   : > { %p773_p10 = pnand %p772_p9, %p768_p6 }
  0x1f   : > { %776 = shalt.err (!%p773_p10)
}
  0x20   : > { %s835_s4 = smov 896   ;;  %s836_s5 = smov 56  }
  0x21   : > { %690 = dma.hbm_to_vmem [thread:$0]  (!%p917_p13), %s158_s19, 3584, %s160_s12, %s147_s20, %s835_s4, %s835_s4, %s836_s5  }
  0x22   : > { %171 = sbr.rel (%p894_p5) target bundleno = 273 (0x111), region = 32  ;;  %s173_s6 = sand.u32 (!%p894_p5), 1, %s822_s13  }
  0x23   : > { %s676_s8 = smul.u32 (!%p894_p5), 224, %s173_s6  ;;  %s174_s9 = scalar_lea.sflag (!%p894_p5), [#allocation3], %s173_s6 }
  0x25   : > { %s937_s10 = scalar_lea.vmem (!%p894_p5), [#allocation2], %s676_s8 }
  0x27   : > { %809 = dma.done.wait (%p887_p4), %s174_s9, 3584  }
  0x28   : > { %811 = vsyncadd (%p887_p4), %s174_s9, 4294963712 }
  0x29   : > { %813 = dma.done.wait (%p879_p1), [#allocation5], 12544  }
  0x2a   : > { %815 = vsyncadd (%p879_p1), [#allocation5], 4294954752  ;;  %v256_v0 = vld [vmem:[#allocation4 + $0x78] sm:$0xff]  ;;  %v255_v4 = vld [vmem:[#allocation4 + $0x70] sm:$0xff]  ;;  %vm343_vm0 = vcmask 130048   ;;  %s650_s22 = sshll.u32 %s640_s16, 2 }
  0x2b   : > { %v272_v1 = vld [vmem:[#allocation4 + $0xf8] sm:$0xff]  ;;  %356 = vmatpush.msra.mxu0 %v256_v0  ;;  %v271_v5 = vld [vmem:[#allocation4 + $0xf0] sm:$0xff]  ;;  %v254_v8 = vld [vmem:[#allocation4 + $0x68] sm:$0xff]  ;;  %p208_p1 = scmp.lt.s32.totalorder %s650_s22, 7 }
  0x2c   : > { %v288_v2 = vld [vmem:[#allocation4 + $0x178] sm:$0xff]  ;;  %385 = vmatpush.msra.mxu1 %v272_v1  ;;  %v287_v6 = vld [vmem:[#allocation4 + $0x170] sm:$0xff]  ;;  %v270_v9 = vld [vmem:[#allocation4 + $0xe8] sm:$0xff] }
  0x2d   : > { %v304_v3 = vld [vmem:[#allocation4 + $0x1f8] sm:$0xff]  ;;  %414 = vmatpush.msra.mxu2 %v288_v2  ;;  %v303_v7 = vld [vmem:[#allocation4 + $0x1f0] sm:$0xff]  ;;  %357 = vmatpush.msra.mxu0 %v255_v4  ;;  %v286_v10 = vld [vmem:[#allocation4 + $0x168] sm:$0xff]  ;;  %s1019_s22 = smov (!%p208_p1, %s650_s22), 7 }
  0x2e   : > { %443 = vmatpush.msra.mxu3 %v304_v3  ;;  %386 = vmatpush.msra.mxu1 %v271_v5  ;;  %v302_v11 = vld [vmem:[#allocation4 + $0x1e8] sm:$0xff]  ;;  %v253_v12 = vld [vmem:[#allocation4 + $0x60] sm:$0xff]  ;;  %v252_v16 = vld [vmem:[#allocation4 + $0x58] sm:$0xff]  ;;  %s651_s7 = sshll.u32 %s1019_s22, 3 }
  0x2f   : > { %415 = vmatpush.msra.mxu2 %v287_v6  ;;  %v269_v13 = vld [vmem:[#allocation4 + $0xe0] sm:$0xff]  ;;  %358 = vmatpush.msra.mxu0 %v254_v8  ;;  %v268_v17 = vld [vmem:[#allocation4 + $0xd8] sm:$0xff]  ;;  %v251_v20 = vld [vmem:[#allocation4 + $0x50] sm:$0xff]  ;;  %s987_s15 = scalar_lea.vmem %s1009_s3, %s651_s7 }
  0x30   : > { %444 = vmatpush.msra.mxu3 %v303_v7  ;;  %387 = vmatpush.msra.mxu1 %v270_v9  ;;  %v285_v14 = vld [vmem:[#allocation4 + $0x160] sm:$0xff]  ;;  %v284_v18 = vld [vmem:[#allocation4 + $0x158] sm:$0xff]  ;;  %v267_v21 = vld [vmem:[#allocation4 + $0xd0] sm:$0xff] }
  0x31   : > { %v301_v15 = vld [vmem:[#allocation4 + $0x1e0] sm:$0xff]  ;;  %416 = vmatpush.msra.mxu2 %v286_v10  ;;  %359 = vmatpush.msra.mxu0 %v253_v12  ;;  %v300_v19 = vld [vmem:[#allocation4 + $0x1d8] sm:$0xff]  ;;  %v283_v22 = vld [vmem:[#allocation4 + $0x150] sm:$0xff] }
  0x32   : > { %445 = vmatpush.msra.mxu3 %v302_v11  ;;  %388 = vmatpush.msra.mxu1 %v269_v13  ;;  %v299_v23 = vld [vmem:[#allocation4 + $0x1d0] sm:$0xff]  ;;  %v250_v24 = vld [vmem:[#allocation4 + $0x48] sm:$0xff]  ;;  %v249_v28 = vld [vmem:[#allocation4 + $0x40] sm:$0xff] }
  0x33   : > { %417 = vmatpush.msra.mxu2 %v285_v14  ;;  %360 = vmatpush.msra.mxu0 %v252_v16  ;;  %v266_v25 = vld [vmem:[#allocation4 + $0xc8] sm:$0xff]  ;;  %v265_v29 = vld [vmem:[#allocation4 + $0xc0] sm:$0xff]  ;;  %v248_v32 = vld [vmem:[#allocation4 + $0x38] sm:$0xff] }
  0x34   : > { %446 = vmatpush.msra.mxu3 %v301_v15  ;;  %389 = vmatpush.msra.mxu1 %v268_v17  ;;  %v282_v26 = vld [vmem:[#allocation4 + $0x148] sm:$0xff]  ;;  %v281_v30 = vld [vmem:[#allocation4 + $0x140] sm:$0xff]  ;;  %v264_v33 = vld [vmem:[#allocation4 + $0xb8] sm:$0xff] }
  0x35   : > { %418 = vmatpush.msra.mxu2 %v284_v18  ;;  %361 = vmatpush.msra.mxu0 %v251_v20  ;;  %v298_v27 = vld [vmem:[#allocation4 + $0x1c8] sm:$0xff]  ;;  %v297_v31 = vld [vmem:[#allocation4 + $0x1c0] sm:$0xff]  ;;  %v280_v34 = vld [vmem:[#allocation4 + $0x138] sm:$0xff] }
  0x36   : > { %447 = vmatpush.msra.mxu3 %v300_v19  ;;  %390 = vmatpush.msra.mxu1 %v267_v21  ;;  %v296_v35 = vld [vmem:[#allocation4 + $0x1b8] sm:$0xff]  ;;  %v247_v36 = vld [vmem:[#allocation4 + $0x30] sm:$0xff]  ;;  %v246_v40 = vld [vmem:[#allocation4 + $0x28] sm:$0xff] }
  0x37   : > { %419 = vmatpush.msra.mxu2 %v283_v22  ;;  %362 = vmatpush.msra.mxu0 %v250_v24  ;;  %v263_v37 = vld [vmem:[#allocation4 + $0xb0] sm:$0xff]  ;;  %v262_v41 = vld [vmem:[#allocation4 + $0xa8] sm:$0xff]  ;;  %v245_v44 = vld [vmem:[#allocation4 + $0x20] sm:$0xff] }
  0x38   : > { %448 = vmatpush.msra.mxu3 %v299_v23  ;;  %391 = vmatpush.msra.mxu1 %v266_v25  ;;  %v279_v38 = vld [vmem:[#allocation4 + $0x130] sm:$0xff]  ;;  %v278_v42 = vld [vmem:[#allocation4 + $0x128] sm:$0xff]  ;;  %v261_v45 = vld [vmem:[#allocation4 + $0xa0] sm:$0xff] }
  0x39   : > { %420 = vmatpush.msra.mxu2 %v282_v26  ;;  %363 = vmatpush.msra.mxu0 %v249_v28  ;;  %v295_v39 = vld [vmem:[#allocation4 + $0x1b0] sm:$0xff]  ;;  %v294_v43 = vld [vmem:[#allocation4 + $0x1a8] sm:$0xff]  ;;  %v277_v46 = vld [vmem:[#allocation4 + $0x120] sm:$0xff] }
  0x3a   : > { %449 = vmatpush.msra.mxu3 %v298_v27  ;;  %392 = vmatpush.msra.mxu1 %v265_v29  ;;  %v293_v47 = vld [vmem:[#allocation4 + $0x1a0] sm:$0xff]  ;;  %v244_v48 = vld [vmem:[#allocation4 + $0x18] sm:$0xff]  ;;  %v243_v52 = vld [vmem:[#allocation4 + $0x10] sm:$0xff] }
  0x3b   : > { %421 = vmatpush.msra.mxu2 %v281_v30  ;;  %364 = vmatpush.msra.mxu0 %v248_v32  ;;  %v260_v49 = vld [vmem:[#allocation4 + $0x98] sm:$0xff]  ;;  %v259_v53 = vld [vmem:[#allocation4 + $0x90] sm:$0xff]  ;;  %v242_v56 = vld [vmem:[#allocation4 + $0x8] sm:$0xff] }
  0x3c   : > { %450 = vmatpush.msra.mxu3 %v297_v31  ;;  %393 = vmatpush.msra.mxu1 %v264_v33  ;;  %v276_v50 = vld [vmem:[#allocation4 + $0x118] sm:$0xff]  ;;  %v275_v54 = vld [vmem:[#allocation4 + $0x110] sm:$0xff]  ;;  %v258_v57 = vld [vmem:[#allocation4 + $0x88] sm:$0xff] }
  0x3d   : > { %422 = vmatpush.msra.mxu2 %v280_v34  ;;  %365 = vmatpush.msra.mxu0 %v247_v36  ;;  %v292_v51 = vld [vmem:[#allocation4 + $0x198] sm:$0xff]  ;;  %v291_v55 = vld [vmem:[#allocation4 + $0x190] sm:$0xff]  ;;  %v274_v58 = vld [vmem:[#allocation4 + $0x108] sm:$0xff] }
  0x3e   : > { %451 = vmatpush.msra.mxu3 %v296_v35  ;;  %394 = vmatpush.msra.mxu1 %v263_v37  ;;  %v290_v59 = vld [vmem:[#allocation4 + $0x188] sm:$0xff]  ;;  %v241_v60 = vld [vmem:[#allocation4] sm:$0xff]  ;;  %v215_v2 = vld [vmem:[%s937_s10 + $0x10] sm:$0xff] }
  0x3f   : > { %423 = vmatpush.msra.mxu2 %v279_v38  ;;  %366 = vmatpush.msra.mxu0 %v246_v40  ;;  %v257_v61 = vld [vmem:[#allocation4 + $0x80] sm:$0xff]  ;;  %v214_v1 = vld [vmem:[%s937_s10 + $0x8] sm:$0xff]  ;;  %v216_v3 = vld [vmem:[%s937_s10 + $0x18] sm:$0xff] }
  0x40   : > { %452 = vmatpush.msra.mxu3 %v295_v39  ;;  %395 = vmatpush.msra.mxu1 %v262_v41  ;;  %v273_v62 = vld [vmem:[#allocation4 + $0x100] sm:$0xff]  ;;  %v338_v4 = vld [vmem:[#allocation4 + $0x308] sm:$0xff]  ;;  %v320_v5 = vld [vmem:[#allocation4 + $0x278] sm:$0xff] }
  0x41   : > { %424 = vmatpush.msra.mxu2 %v278_v42  ;;  %367 = vmatpush.msra.mxu0 %v245_v44  ;;  %v289_v63 = vld [vmem:[#allocation4 + $0x180] sm:$0xff]  ;;  %v336_v6 = vld [vmem:[#allocation4 + $0x2f8] sm:$0xff]  ;;  %v319_v7 = vld [vmem:[#allocation4 + $0x270] sm:$0xff] }
  0x42   : > { %453 = vmatpush.msra.mxu3 %v294_v43  ;;  %396 = vmatpush.msra.mxu1 %v261_v45  ;;  %v213_v0 = vld [vmem:[%s937_s10] sm:$0xff]  ;;  %v335_v9 = vld [vmem:[#allocation4 + $0x2f0] sm:$0xff]  ;;  %v318_v10 = vld [vmem:[#allocation4 + $0x268] sm:$0xff] }
  0x43   : > { %425 = vmatpush.msra.mxu2 %v277_v46  ;;  %368 = vmatpush.msra.mxu0 %v244_v48  ;;  %v337_v8 = vld [vmem:[#allocation4 + $0x300] sm:$0xff]  ;;  %v334_v11 = vld [vmem:[#allocation4 + $0x2e8] sm:$0xff]  ;;  %v220_v15 = vld [vmem:[%s937_s10 + $0x38] sm:$0xff] }
  0x44   : > { %454 = vmatpush.msra.mxu3 %v293_v47  ;;  %397 = vmatpush.msra.mxu1 %v260_v49  ;;  %v317_v12 = vld [vmem:[#allocation4 + $0x260] sm:$0xff]  ;;  %v222_v16 = vld [vmem:[%s937_s10 + $0x48] sm:$0xff]  ;;  %v223_v17 = vld [vmem:[%s937_s10 + $0x50] sm:$0xff] }
  0x45   : > { %426 = vmatpush.msra.mxu2 %v276_v50  ;;  %369 = vmatpush.msra.mxu0 %v243_v52  ;;  %v221_v13 = vld [vmem:[%s937_s10 + $0x40] sm:$0xff]  ;;  %v316_v18 = vld [vmem:[#allocation4 + $0x258] sm:$0xff]  ;;  %v315_v20 = vld [vmem:[#allocation4 + $0x250] sm:$0xff] }
  0x46   : > { %455 = vmatpush.msra.mxu3 %v292_v51  ;;  %398 = vmatpush.msra.mxu1 %v259_v53  ;;  %v333_v14 = vld [vmem:[#allocation4 + $0x2e0] sm:$0xff]  ;;  %v332_v19 = vld [vmem:[#allocation4 + $0x2d8] sm:$0xff]  ;;  %v331_v21 = vld [vmem:[#allocation4 + $0x2d0] sm:$0xff] }
  0x47   : > { %427 = vmatpush.msra.mxu2 %v275_v54  ;;  %370 = vmatpush.msra.mxu0 %v242_v56  ;;  %v314_v22 = vld [vmem:[#allocation4 + $0x248] sm:$0xff]  ;;  %v313_v24 = vld [vmem:[#allocation4 + $0x240] sm:$0xff]  ;;  %v228_v25 = vld [vmem:[%s937_s10 + $0x78] sm:$0xff] }
  0x48   : > { %456 = vmatpush.msra.mxu3 %v291_v55  ;;  %399 = vmatpush.msra.mxu1 %v258_v57  ;;  %v330_v23 = vld [vmem:[#allocation4 + $0x2c8] sm:$0xff]  ;;  %v329_v26 = vld [vmem:[#allocation4 + $0x2c0] sm:$0xff]  ;;  %v227_v27 = vld [vmem:[%s937_s10 + $0x70] sm:$0xff] }
  0x49   : > { %428 = vmatpush.msra.mxu2 %v274_v58  ;;  %371 = vmatpush.msra.mxu0 %v241_v60  ;;  %v229_v28 = vld [vmem:[%s937_s10 + $0x80] sm:$0xff]  ;;  %v230_v29 = vld [vmem:[%s937_s10 + $0x88] sm:$0xff]  ;;  %v312_v30 = vld [vmem:[#allocation4 + $0x238] sm:$0xff] }
  0x4a   : > { %457 = vmatpush.msra.mxu3 %v290_v59  ;;  %400 = vmatpush.msra.mxu1 %v257_v61  ;;  %v328_v31 = vld [vmem:[#allocation4 + $0x2b8] sm:$0xff]  ;;  %v311_v32 = vld [vmem:[#allocation4 + $0x230] sm:$0xff]  ;;  %v310_v34 = vld [vmem:[#allocation4 + $0x228] sm:$0xff] }
  0x4b   : > { %429 = vmatpush.msra.mxu2 %v273_v62  ;;  %372 = vmatmul.f32.vlgmr.msra.gmra.mxu0 %v213_v0  ;;  %v327_v33 = vld [vmem:[#allocation4 + $0x2b0] sm:$0xff]  ;;  %v326_v35 = vld [vmem:[#allocation4 + $0x2a8] sm:$0xff]  ;;  %v309_v36 = vld [vmem:[#allocation4 + $0x220] sm:$0xff] }
  0x4c   : > { %458 = vmatpush.msra.mxu3 %v289_v63  ;;  %401 = vmatmul.f32.vlgmr.msra.gmra.mxu1 %v214_v1  ;;  %v235_v37 = vld [vmem:[%s937_s10 + $0xb0] sm:$0xff]  ;;  %v325_v38 = vld [vmem:[#allocation4 + $0x2a0] sm:$0xff]  ;;  %v234_v39 = vld [vmem:[%s937_s10 + $0xa8] sm:$0xff] }
  0x4d   : > { %430 = vmatmul.f32.vlgmr.msra.gmra.mxu2 %v215_v2  ;;  %459 = vmatmul.f32.vlgmr.msra.gmra.mxu3 %v216_v3  ;;  %v236_v40 = vld [vmem:[%s937_s10 + $0xb8] sm:$0xff]  ;;  %v237_v41 = vld [vmem:[%s937_s10 + $0xc0] sm:$0xff]  ;;  %v307_v44 = vld [vmem:[#allocation4 + $0x210] sm:$0xff] }
  0x4e   : > { %544 = vmatpush.msrb.mxu2 %v338_v4  ;;  %472 = vmatpush.msrb.mxu0 %v320_v5  ;;  %v308_v42 = vld [vmem:[#allocation4 + $0x218] sm:$0xff]  ;;  %v323_v45 = vld [vmem:[#allocation4 + $0x290] sm:$0xff]  ;;  %v306_v46 = vld [vmem:[#allocation4 + $0x208] sm:$0xff] }
  0x4f   : > { %658 = vmatpush.msrb.mxu3 %v320_v5  ;;  %501 = vmatpush.msrb.mxu1 %v336_v6  ;;  %v324_v43 = vld [vmem:[#allocation4 + $0x298] sm:$0xff]  ;;  %v322_v47 = vld [vmem:[#allocation4 + $0x288] sm:$0xff]  ;;  %v305_v48 = vld [vmem:[#allocation4 + $0x200] sm:$0xff] }
  0x50   : > { %473 = vmatpush.msrb.mxu0 %v319_v7  ;;  %545 = vmatpush.msrb.mxu2 %v337_v8  ;;  %v321_v49 = vld [vmem:[#allocation4 + $0x280] sm:$0xff]  ;;  %v224_v51 = vld [vmem:[%s937_s10 + $0x58] sm:$0xff]  ;;  %v218_v52 = vld [vmem:[%s937_s10 + $0x28] sm:$0xff] }
  0x51   : > { %659 = vmatpush.msrb.mxu3 %v319_v7  ;;  %502 = vmatpush.msrb.mxu1 %v335_v9  ;;  %v217_v50 = vld [vmem:[%s937_s10 + $0x20] sm:$0xff]  ;;  %v219_v53 = vld [vmem:[%s937_s10 + $0x30] sm:$0xff]  ;;  %v226_v56 = vld [vmem:[%s937_s10 + $0x68] sm:$0xff] }
  0x52   : > { %474 = vmatpush.msrb.mxu0 %v318_v10  ;;  %v231_v54 = vld [vmem:[%s937_s10 + $0x90] sm:$0xff]  ;;  %v225_v55 = vld [vmem:[%s937_s10 + $0x60] sm:$0xff]  ;;  %v238_v57 = vld [vmem:[%s937_s10 + $0xc8] sm:$0xff] }
  0x53   : > { %660 = vmatpush.msrb.mxu3 %v318_v10  ;;  %503 = vmatpush.msrb.mxu1 %v334_v11  ;;  %v232_v58 = vld [vmem:[%s937_s10 + $0x98] sm:$0xff]  ;;  %v233_v59 = vld [vmem:[%s937_s10 + $0xa0] sm:$0xff]  ;;  %v239_v60 = vld [vmem:[%s937_s10 + $0xd0] sm:$0xff] }
  0x54   : > { %475 = vmatpush.msrb.mxu0 %v317_v12  ;;  %404 = vmatmul.f32.gmra.mxu1 %v221_v13  ;;  %v240_v61 = vld [vmem:[%s937_s10 + $0xd8] sm:$0xff]  ;;  %v731_v8 = vld [vmem:[%s1008_s2] ss:$0 sm:$0xff] }
  0x55   : > { %661 = vmatpush.msrb.mxu3 %v317_v12  ;;  %504 = vmatpush.msrb.mxu1 %v333_v14 }
  0x56   : > { %375 = vmatmul.f32.gmra.mxu0 %v220_v15  ;;  %433 = vmatmul.f32.gmra.mxu2 %v222_v16 }
  0x57   : > { %462 = vmatmul.f32.gmra.mxu3 %v223_v17  ;;  %476 = vmatpush.msrb.mxu0 %v316_v18 }
  0x58   : > { %662 = vmatpush.msrb.mxu3 %v316_v18  ;;  %505 = vmatpush.msrb.mxu1 %v332_v19 }
  0x59   : > { %477 = vmatpush.msrb.mxu0 %v315_v20 }
  0x5a   : > { %663 = vmatpush.msrb.mxu3 %v315_v20  ;;  %506 = vmatpush.msrb.mxu1 %v331_v21 }
  0x5b   : > { %478 = vmatpush.msrb.mxu0 %v314_v22 }
  0x5c   : > { %664 = vmatpush.msrb.mxu3 %v314_v22  ;;  %507 = vmatpush.msrb.mxu1 %v330_v23 }
  0x5d   : > { %479 = vmatpush.msrb.mxu0 %v313_v24  ;;  %407 = vmatmul.f32.gmra.mxu1 %v228_v25 }
  0x5e   : > { %665 = vmatpush.msrb.mxu3 %v313_v24  ;;  %508 = vmatpush.msrb.mxu1 %v329_v26 }
  0x5f   : > { %378 = vmatmul.f32.gmra.mxu0 %v227_v27  ;;  %436 = vmatmul.f32.gmra.mxu2 %v229_v28 }
  0x60   : > { %465 = vmatmul.f32.gmra.mxu3 %v230_v29  ;;  %480 = vmatpush.msrb.mxu0 %v312_v30 }
  0x61   : > { %666 = vmatpush.msrb.mxu3 %v312_v30  ;;  %509 = vmatpush.msrb.mxu1 %v328_v31 }
  0x62   : > { %481 = vmatpush.msrb.mxu0 %v311_v32 }
  0x63   : > { %667 = vmatpush.msrb.mxu3 %v311_v32  ;;  %510 = vmatpush.msrb.mxu1 %v327_v33 }
  0x64   : > { %482 = vmatpush.msrb.mxu0 %v310_v34 }
  0x65   : > { %668 = vmatpush.msrb.mxu3 %v310_v34  ;;  %511 = vmatpush.msrb.mxu1 %v326_v35 }
  0x66   : > { %483 = vmatpush.msrb.mxu0 %v309_v36  ;;  %410 = vmatmul.f32.gmra.mxu1 %v235_v37 }
  0x67   : > { %669 = vmatpush.msrb.mxu3 %v309_v36  ;;  %512 = vmatpush.msrb.mxu1 %v325_v38 }
  0x68   : > { %381 = vmatmul.f32.gmra.mxu0 %v234_v39  ;;  %439 = vmatmul.f32.gmra.mxu2 %v236_v40 }
  0x69   : > { %468 = vmatmul.f32.gmra.mxu3 %v237_v41  ;;  %484 = vmatpush.msrb.mxu0 %v308_v42 }
  0x6a   : > { %670 = vmatpush.msrb.mxu3 %v308_v42  ;;  %513 = vmatpush.msrb.mxu1 %v324_v43 }
  0x6b   : > { %485 = vmatpush.msrb.mxu0 %v307_v44 }
  0x6c   : > { %671 = vmatpush.msrb.mxu3 %v307_v44  ;;  %514 = vmatpush.msrb.mxu1 %v323_v45 }
  0x6d   : > { %486 = vmatpush.msrb.mxu0 %v306_v46 }
  0x6e   : > { %672 = vmatpush.msrb.mxu3 %v306_v46  ;;  %515 = vmatpush.msrb.mxu1 %v322_v47 }
  0x6f   : > { %487 = vmatpush.msrb.mxu0 %v305_v48 }
  0x70   : > { %673 = vmatpush.msrb.mxu3 %v305_v48  ;;  %516 = vmatpush.msrb.mxu1 %v321_v49 }
  0x71   : > { %488 = vmatmul.f32.vlgmr.msrb.gmra.mxu0 %v217_v50  ;;  %491 = vmatmul.f32.vlgmr.msrb.gmra.mxu3 %v224_v51 }
  0x72   : > { %517 = vmatmul.f32.vlgmr.msrb.gmra.mxu1 %v218_v52  ;;  %652 = vmatmul.msk.f32.vlgmr.msrb.gmra.mxu2 %vm343_vm0, %v219_v53 }
  0x79   : > { %494 = vmatmul.f32.gmra.mxu3 %v231_v54 }
  0x7a   : > { %520 = vmatmul.f32.gmra.mxu1 %v225_v55  ;;  %653 = vmatmul.msk.f32.gmra.mxu2 %vm343_vm0, %v226_v56 }
  0x81   : > { %497 = vmatmul.f32.gmra.mxu3 %v238_v57 }
  0x82   : > { %523 = vmatmul.f32.gmra.mxu1 %v232_v58  ;;  %654 = vmatmul.msk.f32.gmra.mxu2 %vm343_vm0, %v233_v59 }
  0x8a   : > { %526 = vmatmul.f32.gmra.mxu1 %v239_v60  ;;  %655 = vmatmul.msk.f32.gmra.mxu2 %vm343_vm0, %v240_v61 }
  0xc8   : > { %v373_v62 = vpop.f32.mrf.mxu0 }
  0xc9   : > { %v402_v63 = vpop.f32.mrf.mxu1  ;;  %v374_v9 = vadd.f32 %v731_v8, %v373_v62 }
  0xcb   : > { %v403_v14 = vadd.f32 %v402_v63, %v374_v9 }
  0xd0   : > { %v431_v0 = vpop.f32.mrf.mxu2  ;;  %v460_v1 = vpop.f32.mrf.mxu3 }
  0xd1   : > { %v405_v2 = vpop.f32.mrf.mxu1  ;;  %v432_v15 = vadd.f32 %v431_v0, %v403_v14 }
  0xd3   : > { %v376_v3 = vpop.f32.mrf.mxu0  ;;  %v461_v19 = vadd.f32 %v460_v1, %v432_v15 }
  0xd4   : > { %v377_v16 = vadd.f32 %v731_v8, %v376_v3 }
  0xd6   : > { %v406_v20 = vadd.f32 %v405_v2, %v377_v16 }
  0xd9   : > { %v434_v4 = vpop.f32.mrf.mxu2 }
  0xda   : > { %v463_v5 = vpop.f32.mrf.mxu3  ;;  %v408_v6 = vpop.f32.mrf.mxu1  ;;  %v435_v24 = vadd.f32 %v434_v4, %v406_v20 }
  0xdc   : > { %v379_v7 = vpop.f32.mrf.mxu0  ;;  %v464_v29 = vadd.f32 %v463_v5, %v435_v24 }
  0xdd   : > { %v380_v25 = vadd.f32 %v731_v8, %v379_v7 }
  0xdf   : > { %v409_v30 = vadd.f32 %v408_v6, %v380_v25 }
  0xe2   : > { %v437_v10 = vpop.f32.mrf.mxu2 }
  0xe3   : > { %v466_v11 = vpop.f32.mrf.mxu3  ;;  %v411_v13 = vpop.f32.mrf.mxu1  ;;  %v438_v34 = vadd.f32 %v437_v10, %v409_v30 }
  0xe5   : > { %v382_v12 = vpop.f32.mrf.mxu0  ;;  %v467_v39 = vadd.f32 %v466_v11, %v438_v34 }
  0xe6   : > { %v383_v35 = vadd.f32 %v731_v8, %v382_v12 }
  0xe8   : > { %v412_v40 = vadd.f32 %v411_v13, %v383_v35 }
  0xeb   : > { %v440_v17 = vpop.f32.mrf.mxu2 }
  0xec   : > { %v469_v18 = vpop.f32.mrf.mxu3  ;;  %v441_v44 = vadd.f32 %v440_v17, %v412_v40 }
  0xee   : > { %v489_v21 = vpop.f32.mrf.mxu0  ;;  %v470_v48 = vadd.f32 %v469_v18, %v441_v44 }
  0xef   : > { %v518_v22 = vpop.f32.mrf.mxu1  ;;  %v490_v23 = vadd.f32 %v489_v21, %v461_v19 }
  0xf1   : > { %v519_v26 = vadd.f32 %v518_v22, %v490_v23 }
  0xf4   : > { %v492_v27 = vpop.f32.mrf.mxu3 }
  0xf5   : > { %v547_v28 = vpop.f32.mrf.mxu2  ;;  %v493_v33 = vadd.f32 %v492_v27, %v464_v29 }
  0xf6   : > { %v548_v31 = vadd.f32 %v547_v28, %v519_v26 }
  0xf7   : > { %v521_v32 = vpop.f32.mrf.mxu1 }
  0xf8   : > { %559 = vst [vmem:[%s987_s15] sm:$0xff] %v548_v31  ;;  %v522_v36 = vadd.f32 %v521_v32, %v493_v33 }
  0xfc   : > { %v495_v37 = vpop.f32.mrf.mxu3 }
  0xfd   : > { %v550_v38 = vpop.f32.mrf.mxu2  ;;  %v496_v43 = vadd.f32 %v495_v37, %v467_v39 }
  0xfe   : > { %v551_v41 = vadd.f32 %v550_v38, %v522_v36 }
  0xff   : > { %v524_v42 = vpop.f32.mrf.mxu1 }
 0x100   : > { %560 = vst [vmem:[%s987_s15 + $0x8] sm:$0xff] %v551_v41  ;;  %v525_v45 = vadd.f32 %v524_v42, %v496_v43 }
 0x104   : > { %v498_v46 = vpop.f32.mrf.mxu3 }
 0x105   : > { %v553_v47 = vpop.f32.mrf.mxu2  ;;  %v499_v50 = vadd.f32 %v498_v46, %v470_v48 }
 0x106   : > { %v554_v49 = vadd.f32 %v553_v47, %v525_v45 }
 0x107   : > { %v527_v51 = vpop.f32.mrf.mxu1 }
 0x108   : > { %561 = vst [vmem:[%s987_s15 + $0x10] sm:$0xff] %v554_v49  ;;  %v528_v52 = vadd.f32 %v527_v51, %v499_v50 }
 0x10d   : > { %v556_v53 = vpop.f32.mrf.mxu2 }
 0x10e   : > { %v557_v54 = vadd.f32 %v556_v53, %v528_v52 }
 0x110   : > { %562 = vst [vmem:[%s987_s15 + $0x18] sm:$0xff] %v557_v54 }
 0x111 PF: > { %p14_p4 = scmp.ge.s32.totalorder %s903_s25, 4   ;;  %s1014_s12 = smov %s822_s13 }
 0x112   : > { %s1015_s13 = smov %s826_s14  ;;  %s1016_s14 = smov %s913_s30 }
 0x113   : > { %s1017_s15 = smov %s903_s25  ;;  %16 = sbr.rel (!%p14_p4) target bundleno = 4 (0x4), region = 76 }
 0x118   :  { %585 = vsyncpa [#allocation3], 1 }
 0x119   :  { %587 = vsyncpa [#allocation3 + $0x1], 1 }
 0x11a   :  { %588 = vsyncpa [#allocation5], 1 }

</bundles_post_ra>
